<compile_context>
chip_gen: v7x
topology: tpu7x:2x2x1
jax: 0.10.0
libtpu: 0.0.40
codegen_flags: <defaults>
</compile_context>

<pallas_src>
import functools

import jax
import jax.numpy as jnp
from jax.experimental import pallas as pl
from jax.experimental.pallas import tpu as pltpu


def _round_up(n, m):
    return ((n + m - 1) // m) * m


def _lstm_kernel(x_ref, wx_ref, wh_ref, b_ref, hT_ref, c_ref, xw_ref,
                 *, seq_len, padded_len):
    # x_ref : (Tc*TB, D)   time-major flattened chunk for this batch tile
    # wx_ref: (D, 4H)  wh_ref: (H, 4H)  b_ref: (1, 4H)
    # hT_ref: (TB, H)  resident output block = h carry
    # c_ref : (TB, H)  VMEM scratch = c carry
    # xw_ref: (Tc*TB, 4H) VMEM scratch = chunk input projection
    tchunk = pl.program_id(1)
    TB, H = hT_ref.shape
    Tc = x_ref.shape[0] // TB
    needs_mask = padded_len != seq_len          # static Python bool

    @pl.when(tchunk == 0)
    def _():
        hT_ref[...] = jnp.zeros_like(hT_ref)
        c_ref[...] = jnp.zeros_like(c_ref)

    # Time-parallel input projection for the whole chunk: ONE tall MXU matmul,
    # bias folded in once, no in-kernel reshapes (x is pre-flattened).
    xw_ref[...] = (jnp.dot(x_ref[...], wx_ref[...],
                           preferred_element_type=jnp.float32) + b_ref[...])

    wh = wh_ref[...]                            # (H, 4H), hoisted out of the loop

    def step(t, carry):
        h, c = carry
        row0 = pl.multiple_of(t * TB, TB)       # sublane-aligned slab start
        gates = xw_ref[pl.ds(row0, TB), :] + jnp.dot(
            h, wh, preferred_element_type=jnp.float32)      # (TB, 4H)
        # One full-vreg sigmoid + one full-vreg tanh (2 EUP pushes) instead of
        # four quarter-width per-gate transcendentals; slice afterwards.
        sig = jax.nn.sigmoid(gates)
        tnh = jnp.tanh(gates)
        i_g = sig[:, 0 * H:1 * H]
        f_g = sig[:, 1 * H:2 * H]
        o_g = sig[:, 3 * H:4 * H]
        g_g = tnh[:, 2 * H:3 * H]
        c_new = f_g * c + i_g * g_g
        h_new = o_g * jnp.tanh(c_new)
        if needs_mask:
            # Padded (zeroed) time steps are NOT identity steps for an LSTM
            # (forget gate = sigmoid(b_f) != 1): pass (h, c) through instead.
            keep = (tchunk * Tc + t) < seq_len
            h_new = jnp.where(keep, h_new, h)
            c_new = jnp.where(keep, c_new, c)
        return h_new, c_new

    h, c = jax.lax.fori_loop(0, Tc, step, (hT_ref[...], c_ref[...]),
                             unroll=min(Tc, 8))
    hT_ref[...] = h
    c_ref[...] = c


def lstm_classifier_forward(x, params, *, max_batch_tile=128,
                            vmem_chunk_budget=8 * 1024 * 1024):
    """x: (B, T, D) batch_first float32. Returns (B, 1) sigmoid outputs."""
    B, T, D = x.shape
    H = params["w_hh"].shape[1]
    G = 4 * H

    # PyTorch: w_ih (4H, D), w_hh (4H, H), gate rows stacked [i; f; g; o].
    # Transpose so gates sit along the last (lane) dim: x @ Wx -> (.., i|f|g|o).
    wx = params["w_ih"].T                                   # (D, 4H)
    wh = params["w_hh"].T                                   # (H, 4H)
    b = (params["b_ih"] + params["b_hh"]).reshape(1, G)     # (1, 4H)

    # Batch tiling: pad each tile to a multiple of 8 sublanes, grow the tile
    # toward the MXU height, and shard tiles across TensorCores ("parallel").
    TB = min(max_batch_tile, _round_up(B, 8))
    Bp = _round_up(B, TB)
    NB = Bp // TB

    # Time-chunk size from a VMEM budget (double-buffered x chunk + xw scratch,
    # f32); stays well under the default 32 MiB scoped VMEM limit.
    per_step_bytes = (2 * TB * D + TB * G) * 4
    Tc = int(max(1, min(256, vmem_chunk_budget // per_step_bytes, T)))
    T_pad = _round_up(T, Tc)
    NT = T_pad // Tc

    # Layout: (NB, T_pad*TB, D); within each batch tile, row = t*TB + b_local
    # (time-major), pre-flattened so the kernel needs no reshapes.
    x_p = jnp.pad(x, ((0, Bp - B), (0, T_pad - T), (0, 0)))         # (Bp, T_pad, D)
    x_p = x_p.reshape(NB, TB, T_pad, D).transpose(0, 2, 1, 3)       # (NB, T_pad, TB, D)
    x_flat = x_p.reshape(NB, T_pad * TB, D)

    kernel = functools.partial(_lstm_kernel, seq_len=T, padded_len=T_pad)

    h_T = pl.pallas_call(
        kernel,
        out_shape=jax.ShapeDtypeStruct((Bp, H), jnp.float32),
        grid_spec=pltpu.PrefetchScalarGridSpec(
            num_scalar_prefetch=0,
            grid=(NB, NT),
            in_specs=[
                pl.BlockSpec((None, Tc * TB, D), lambda nb, t: (nb, t, 0)),  # x chunk
                pl.BlockSpec((D, G), lambda nb, t: (0, 0)),                  # Wx
                pl.BlockSpec((H, G), lambda nb, t: (0, 0)),                  # Wh
                pl.BlockSpec((1, G), lambda nb, t: (0, 0)),                  # bias
            ],
            out_specs=pl.BlockSpec((TB, H), lambda nb, t: (nb, 0)),  # h carry, resident over t
            scratch_shapes=[
                pltpu.VMEM((TB, H), jnp.float32),                    # c carry
                pltpu.VMEM((Tc * TB, G), jnp.float32),               # chunk x@Wx + b
            ],
        ),
        compiler_params=pltpu.CompilerParams(
            dimension_semantics=("parallel", "arbitrary")),
    )(x_flat, wx, wh, b)

    # Final Linear(H -> 1) + sigmoid on the unpadded batch, done in the wrapper
    # (lane-dense kernel output; the N=1 matmul is trivially cheap in XLA).
    logits = h_T[:B] @ params["fc_w"].T + params["fc_b"]
    return jax.nn.sigmoid(logits)


def _reference_forward(x, params):
    """Pure-JAX reference matching torch.nn.LSTM + Linear + sigmoid."""
    B, T, D = x.shape
    H = params["w_hh"].shape[1]
    w_ih, w_hh = params["w_ih"], params["w_hh"]
    b = params["b_ih"] + params["b_hh"]
    h = jnp.zeros((B, H), jnp.float32)
    c = jnp.zeros((B, H), jnp.float32)
    for t in range(T):
        gates = x[:, t, :] @ w_ih.T + h @ w_hh.T + b
        i_g, f_g, g_g, o_g = jnp.split(gates, 4, axis=-1)
        i_g = jax.nn.sigmoid(i_g)
        f_g = jax.nn.sigmoid(f_g)
        g_g = jnp.tanh(g_g)
        o_g = jax.nn.sigmoid(o_g)
        c = f_g * c + i_g * g_g
        h = o_g * jnp.tanh(c)
    logits = h @ params["fc_w"].T + params["fc_b"]
    return jax.nn.sigmoid(logits)


def _init_params(key, input_size, hidden_size):
    """Deterministic init mirroring nn.LSTM / nn.Linear shapes."""
    H, D = hidden_size, input_size
    k = 1.0 / jnp.sqrt(jnp.float32(H))
    keys = jax.random.split(key, 6)
    u = lambda kk, shape: jax.random.uniform(kk, shape, jnp.float32, -k, k)
    return {
        "w_ih": u(keys[0], (4 * H, D)),
        "w_hh": u(keys[1], (4 * H, H)),
        "b_ih": u(keys[2], (4 * H,)),
        "b_hh": u(keys[3], (4 * H,)),
        "fc_w": u(keys[4], (1, H)),
        "fc_b": u(keys[5], (1,)),
    }


if __name__ == "__main__":
    B, T, D, H = 2, 8, 16, 32

    key = jax.random.PRNGKey(0)
    kx, kp = jax.random.split(key)
    x = jax.random.normal(kx, (B, T, D), jnp.float32)
    params = _init_params(kp, D, H)

    out = lstm_classifier_forward(x, params)
    out = jax.block_until_ready(out)

    ref = _reference_forward(x, params)
    assert out.shape == (B, 1)
    assert jnp.allclose(out, ref, atol=1e-5, rtol=1e-5), (out, ref)

    print("KERNEL_OK")
</pallas_src>

<mosaic_0001>
module attributes {stable_mosaic.version = 11 : i64} {
  func.func @_lstm_kernel(%arg0: i32, %arg1: i32, %arg2: memref<1x64x16xf32, #tpu.memory_space<vmem>>, %arg3: memref<16x128xf32, #tpu.memory_space<vmem>>, %arg4: memref<32x128xf32, #tpu.memory_space<vmem>>, %arg5: memref<1x128xf32, #tpu.memory_space<vmem>>, %arg6: memref<8x32xf32, #tpu.memory_space<vmem>>, %arg7: memref<8x32xf32, #tpu.memory_space<vmem>>, %arg8: memref<64x128xf32, #tpu.memory_space<vmem>>) attributes {dimension_semantics = [#tpu.dimension_semantics<parallel>, #tpu.dimension_semantics<arbitrary>], iteration_bounds = array<i64: 1, 1>, scalar_prefetch = 0 : i64, scratch_operands = 2 : i64, tpu.core_type = #tpu.core_type<tc>, window_params = [{transform_indices = @transform_0, window_bounds = array<i64: 1, 64, 16>}, {pipeline_mode = #tpu.pipeline_mode<synchronous>, transform_indices = @transform_1, window_bounds = array<i64: 16, 128>}, {pipeline_mode = #tpu.pipeline_mode<synchronous>, transform_indices = @transform_2, window_bounds = array<i64: 32, 128>}, {pipeline_mode = #tpu.pipeline_mode<synchronous>, transform_indices = @transform_3, window_bounds = array<i64: 1, 128>}, {transform_indices = @transform_4, window_bounds = array<i64: 8, 32>}]} {
    %c0_i32 = arith.constant 0 : i32
    %0 = arith.cmpi eq, %arg1, %c0_i32 : i32
    %1 = arith.extui %0 : i1 to i32
    %c0_i32_0 = arith.constant 0 : i32
    %2 = arith.cmpi ne, %1, %c0_i32_0 : i32
    scf.if %2 {
      %cst_52 = arith.constant 0.000000e+00 : f32
      %184 = vector.broadcast %cst_52 : f32 to vector<8x32xf32>
      %c0_53 = arith.constant 0 : index
      %c0_54 = arith.constant 0 : index
      %185 = vector.load %arg6[%c0_53, %c0_54] : memref<8x32xf32, #tpu.memory_space<vmem>>, vector<8x32xf32>
      tpu.vector_store %arg6[%c0_53, %c0_54], %184 {strides = array<i32>} : memref<8x32xf32, #tpu.memory_space<vmem>>, vector<8x32xf32>,
      %cst_55 = arith.constant 0.000000e+00 : f32
      %186 = vector.broadcast %cst_55 : f32 to vector<8x32xf32>
      %c0_56 = arith.constant 0 : index
      %c0_57 = arith.constant 0 : index
      %187 = vector.load %arg7[%c0_56, %c0_57] : memref<8x32xf32, #tpu.memory_space<vmem>>, vector<8x32xf32>
      tpu.vector_store %arg7[%c0_56, %c0_57], %186 {strides = array<i32>} : memref<8x32xf32, #tpu.memory_space<vmem>>, vector<8x32xf32>,
    } else {
    }
    %c0 = arith.constant 0 : index
    %c0_1 = arith.constant 0 : index
    %c0_2 = arith.constant 0 : index
    %3 = vector.load %arg2[%c0, %c0_1, %c0_2] : memref<1x64x16xf32, #tpu.memory_space<vmem>>, vector<1x64x16xf32>
    %4 = vector.shape_cast %3 : vector<1x64x16xf32> to vector<64x16xf32>
    %c0_3 = arith.constant 0 : index
    %c0_4 = arith.constant 0 : index
    %5 = vector.load %arg3[%c0_3, %c0_4] : memref<16x128xf32, #tpu.memory_space<vmem>>, vector<16x128xf32>
    %cst = arith.constant dense<0.000000e+00> : vector<64x128xf32>
    %6 = tpu.matmul %4, %5, %cst {dimension_numbers = #tpu.dot_dimension_numbers<[1], [0], [0], [1], [0, 0, 1, 1], [], []>} : vector<64x16xf32>, vector<16x128xf32>, vector<64x128xf32> -> vector<64x128xf32>
    %c0_5 = arith.constant 0 : index
    %c0_6 = arith.constant 0 : index
    %7 = vector.load %arg5[%c0_5, %c0_6] : memref<1x128xf32, #tpu.memory_space<vmem>>, vector<1x128xf32>
    %8 = vector.broadcast %7 : vector<1x128xf32> to vector<64x128xf32>
    %9 = arith.addf %6, %8 : vector<64x128xf32>
    %c0_7 = arith.constant 0 : index
    %c0_8 = arith.constant 0 : index
    %10 = vector.load %arg8[%c0_7, %c0_8] : memref<64x128xf32, #tpu.memory_space<vmem>>, vector<64x128xf32>
    tpu.vector_store %arg8[%c0_7, %c0_8], %9 {strides = array<i32>} : memref<64x128xf32, #tpu.memory_space<vmem>>, vector<64x128xf32>,
    %c0_9 = arith.constant 0 : index
    %c0_10 = arith.constant 0 : index
    %11 = vector.load %arg4[%c0_9, %c0_10] : memref<32x128xf32, #tpu.memory_space<vmem>>, vector<32x128xf32>
    %c0_11 = arith.constant 0 : index
    %c0_12 = arith.constant 0 : index
    %12 = vector.load %arg6[%c0_11, %c0_12] : memref<8x32xf32, #tpu.memory_space<vmem>>, vector<8x32xf32>
    %c0_13 = arith.constant 0 : index
    %c0_14 = arith.constant 0 : index
    %13 = vector.load %arg7[%c0_13, %c0_14] : memref<8x32xf32, #tpu.memory_space<vmem>>, vector<8x32xf32>
    %c0_i32_15 = arith.constant 0 : i32
    %c8_i32 = arith.constant 8 : i32
    %14 = arith.muli %c0_i32_15, %c8_i32 : i32
    %15 = tpu.assume_multiple %14, 8 : i32
    %16 = arith.index_cast %15 : i32 to index
    %c0_16 = arith.constant 0 : index
    %17 = vector.load %arg8[%16, %c0_16] : memref<64x128xf32, #tpu.memory_space<vmem>>, vector<8x128xf32>
    %cst_17 = arith.constant dense<0.000000e+00> : vector<8x128xf32>
    %18 = tpu.matmul %12, %11, %cst_17 {dimension_numbers = #tpu.dot_dimension_numbers<[1], [0], [0], [1], [0, 0, 1, 1], [], []>} : vector<8x32xf32>, vector<32x128xf32>, vector<8x128xf32> -> vector<8x128xf32>
    %19 = arith.addf %17, %18 : vector<8x128xf32>
    %20 = arith.negf %19 : vector<8x128xf32>
    %21 = math.exp %20 : vector<8x128xf32>
    %cst_18 = arith.constant 1.000000e+00 : f32
    %22 = vector.broadcast %cst_18 : f32 to vector<8x128xf32>
    %23 = arith.addf %22, %21 : vector<8x128xf32>
    %24 = arith.divf %22, %23 : vector<8x128xf32>
    %25 = math.tanh %19 : vector<8x128xf32>
    %26 = vector.extract_strided_slice %24 {offsets = [0, 0], sizes = [8, 32], strides = [1, 1]} : vector<8x128xf32> to vector<8x32xf32>
    %27 = vector.extract_strided_slice %24 {offsets = [0, 32], sizes = [8, 32], strides = [1, 1]} : vector<8x128xf32> to vector<8x32xf32>
    %28 = vector.extract_strided_slice %24 {offsets = [0, 96], sizes = [8, 32], strides = [1, 1]} : vector<8x128xf32> to vector<8x32xf32>
    %29 = vector.extract_strided_slice %25 {offsets = [0, 64], sizes = [8, 32], strides = [1, 1]} : vector<8x128xf32> to vector<8x32xf32>
    %30 = arith.mulf %27, %13 : vector<8x32xf32>
    %31 = arith.mulf %26, %29 : vector<8x32xf32>
    %32 = arith.addf %30, %31 : vector<8x32xf32>
    %33 = math.tanh %32 : vector<8x32xf32>
    %34 = arith.mulf %28, %33 : vector<8x32xf32>
    %c1_i32 = arith.constant 1 : i32
    %c8_i32_19 = arith.constant 8 : i32
    %35 = arith.muli %c1_i32, %c8_i32_19 : i32
    %36 = tpu.assume_multiple %35, 8 : i32
    %37 = arith.index_cast %36 : i32 to index
    %c0_20 = arith.constant 0 : index
    %38 = vector.load %arg8[%37, %c0_20] : memref<64x128xf32, #tpu.memory_space<vmem>>, vector<8x128xf32>
    %cst_21 = arith.constant dense<0.000000e+00> : vector<8x128xf32>
    %39 = tpu.matmul %34, %11, %cst_21 {dimension_numbers = #tpu.dot_dimension_numbers<[1], [0], [0], [1], [0, 0, 1, 1], [], []>} : vector<8x32xf32>, vector<32x128xf32>, vector<8x128xf32> -> vector<8x128xf32>
    %40 = arith.addf %38, %39 : vector<8x128xf32>
    %41 = arith.negf %40 : vector<8x128xf32>
    %42 = math.exp %41 : vector<8x128xf32>
    %cst_22 = arith.constant 1.000000e+00 : f32
    %43 = vector.broadcast %cst_22 : f32 to vector<8x128xf32>
    %44 = arith.addf %43, %42 : vector<8x128xf32>
    %45 = arith.divf %43, %44 : vector<8x128xf32>
    %46 = math.tanh %40 : vector<8x128xf32>
    %47 = vector.extract_strided_slice %45 {offsets = [0, 0], sizes = [8, 32], strides = [1, 1]} : vector<8x128xf32> to vector<8x32xf32>
    %48 = vector.extract_strided_slice %45 {offsets = [0, 32], sizes = [8, 32], strides = [1, 1]} : vector<8x128xf32> to vector<8x32xf32>
    %49 = vector.extract_strided_slice %45 {offsets = [0, 96], sizes = [8, 32], strides = [1, 1]} : vector<8x128xf32> to vector<8x32xf32>
    %50 = vector.extract_strided_slice %46 {offsets = [0, 64], sizes = [8, 32], strides = [1, 1]} : vector<8x128xf32> to vector<8x32xf32>
    %51 = arith.mulf %48, %32 : vector<8x32xf32>
    %52 = arith.mulf %47, %50 : vector<8x32xf32>
    %53 = arith.addf %51, %52 : vector<8x32xf32>
    %54 = math.tanh %53 : vector<8x32xf32>
    %55 = arith.mulf %49, %54 : vector<8x32xf32>
    %c2_i32 = arith.constant 2 : i32
    %c8_i32_23 = arith.constant 8 : i32
    %56 = arith.muli %c2_i32, %c8_i32_23 : i32
    %57 = tpu.assume_multiple %56, 8 : i32
    %58 = arith.index_cast %57 : i32 to index
    %c0_24 = arith.constant 0 : index
    %59 = vector.load %arg8[%58, %c0_24] : memref<64x128xf32, #tpu.memory_space<vmem>>, vector<8x128xf32>
    %cst_25 = arith.constant dense<0.000000e+00> : vector<8x128xf32>
    %60 = tpu.matmul %55, %11, %cst_25 {dimension_numbers = #tpu.dot_dimension_numbers<[1], [0], [0], [1], [0, 0, 1, 1], [], []>} : vector<8x32xf32>, vector<32x128xf32>, vector<8x128xf32> -> vector<8x128xf32>
    %61 = arith.addf %59, %60 : vector<8x128xf32>
    %62 = arith.negf %61 : vector<8x128xf32>
    %63 = math.exp %62 : vector<8x128xf32>
    %cst_26 = arith.constant 1.000000e+00 : f32
    %64 = vector.broadcast %cst_26 : f32 to vector<8x128xf32>
    %65 = arith.addf %64, %63 : vector<8x128xf32>
    %66 = arith.divf %64, %65 : vector<8x128xf32>
    %67 = math.tanh %61 : vector<8x128xf32>
    %68 = vector.extract_strided_slice %66 {offsets = [0, 0], sizes = [8, 32], strides = [1, 1]} : vector<8x128xf32> to vector<8x32xf32>
    %69 = vector.extract_strided_slice %66 {offsets = [0, 32], sizes = [8, 32], strides = [1, 1]} : vector<8x128xf32> to vector<8x32xf32>
    %70 = vector.extract_strided_slice %66 {offsets = [0, 96], sizes = [8, 32], strides = [1, 1]} : vector<8x128xf32> to vector<8x32xf32>
    %71 = vector.extract_strided_slice %67 {offsets = [0, 64], sizes = [8, 32], strides = [1, 1]} : vector<8x128xf32> to vector<8x32xf32>
    %72 = arith.mulf %69, %53 : vector<8x32xf32>
    %73 = arith.mulf %68, %71 : vector<8x32xf32>
    %74 = arith.addf %72, %73 : vector<8x32xf32>
    %75 = math.tanh %74 : vector<8x32xf32>
    %76 = arith.mulf %70, %75 : vector<8x32xf32>
    %c3_i32 = arith.constant 3 : i32
    %c8_i32_27 = arith.constant 8 : i32
    %77 = arith.muli %c3_i32, %c8_i32_27 : i32
    %78 = tpu.assume_multiple %77, 8 : i32
    %79 = arith.index_cast %78 : i32 to index
    %c0_28 = arith.constant 0 : index
    %80 = vector.load %arg8[%79, %c0_28] : memref<64x128xf32, #tpu.memory_space<vmem>>, vector<8x128xf32>
    %cst_29 = arith.constant dense<0.000000e+00> : vector<8x128xf32>
    %81 = tpu.matmul %76, %11, %cst_29 {dimension_numbers = #tpu.dot_dimension_numbers<[1], [0], [0], [1], [0, 0, 1, 1], [], []>} : vector<8x32xf32>, vector<32x128xf32>, vector<8x128xf32> -> vector<8x128xf32>
    %82 = arith.addf %80, %81 : vector<8x128xf32>
    %83 = arith.negf %82 : vector<8x128xf32>
    %84 = math.exp %83 : vector<8x128xf32>
    %cst_30 = arith.constant 1.000000e+00 : f32
    %85 = vector.broadcast %cst_30 : f32 to vector<8x128xf32>
    %86 = arith.addf %85, %84 : vector<8x128xf32>
    %87 = arith.divf %85, %86 : vector<8x128xf32>
    %88 = math.tanh %82 : vector<8x128xf32>
    %89 = vector.extract_strided_slice %87 {offsets = [0, 0], sizes = [8, 32], strides = [1, 1]} : vector<8x128xf32> to vector<8x32xf32>
    %90 = vector.extract_strided_slice %87 {offsets = [0, 32], sizes = [8, 32], strides = [1, 1]} : vector<8x128xf32> to vector<8x32xf32>
    %91 = vector.extract_strided_slice %87 {offsets = [0, 96], sizes = [8, 32], strides = [1, 1]} : vector<8x128xf32> to vector<8x32xf32>
    %92 = vector.extract_strided_slice %88 {offsets = [0, 64], sizes = [8, 32], strides = [1, 1]} : vector<8x128xf32> to vector<8x32xf32>
    %93 = arith.mulf %90, %74 : vector<8x32xf32>
    %94 = arith.mulf %89, %92 : vector<8x32xf32>
    %95 = arith.addf %93, %94 : vector<8x32xf32>
    %96 = math.tanh %95 : vector<8x32xf32>
    %97 = arith.mulf %91, %96 : vector<8x32xf32>
    %c4_i32 = arith.constant 4 : i32
    %c8_i32_31 = arith.constant 8 : i32
    %98 = arith.muli %c4_i32, %c8_i32_31 : i32
    %99 = tpu.assume_multiple %98, 8 : i32
    %100 = arith.index_cast %99 : i32 to index
    %c0_32 = arith.constant 0 : index
    %101 = vector.load %arg8[%100, %c0_32] : memref<64x128xf32, #tpu.memory_space<vmem>>, vector<8x128xf32>
    %cst_33 = arith.constant dense<0.000000e+00> : vector<8x128xf32>
    %102 = tpu.matmul %97, %11, %cst_33 {dimension_numbers = #tpu.dot_dimension_numbers<[1], [0], [0], [1], [0, 0, 1, 1], [], []>} : vector<8x32xf32>, vector<32x128xf32>, vector<8x128xf32> -> vector<8x128xf32>
    %103 = arith.addf %101, %102 : vector<8x128xf32>
    %104 = arith.negf %103 : vector<8x128xf32>
    %105 = math.exp %104 : vector<8x128xf32>
    %cst_34 = arith.constant 1.000000e+00 : f32
    %106 = vector.broadcast %cst_34 : f32 to vector<8x128xf32>
    %107 = arith.addf %106, %105 : vector<8x128xf32>
    %108 = arith.divf %106, %107 : vector<8x128xf32>
    %109 = math.tanh %103 : vector<8x128xf32>
    %110 = vector.extract_strided_slice %108 {offsets = [0, 0], sizes = [8, 32], strides = [1, 1]} : vector<8x128xf32> to vector<8x32xf32>
    %111 = vector.extract_strided_slice %108 {offsets = [0, 32], sizes = [8, 32], strides = [1, 1]} : vector<8x128xf32> to vector<8x32xf32>
    %112 = vector.extract_strided_slice %108 {offsets = [0, 96], sizes = [8, 32], strides = [1, 1]} : vector<8x128xf32> to vector<8x32xf32>
    %113 = vector.extract_strided_slice %109 {offsets = [0, 64], sizes = [8, 32], strides = [1, 1]} : vector<8x128xf32> to vector<8x32xf32>
    %114 = arith.mulf %111, %95 : vector<8x32xf32>
    %115 = arith.mulf %110, %113 : vector<8x32xf32>
    %116 = arith.addf %114, %115 : vector<8x32xf32>
    %117 = math.tanh %116 : vector<8x32xf32>
    %118 = arith.mulf %112, %117 : vector<8x32xf32>
    %c5_i32 = arith.constant 5 : i32
    %c8_i32_35 = arith.constant 8 : i32
    %119 = arith.muli %c5_i32, %c8_i32_35 : i32
    %120 = tpu.assume_multiple %119, 8 : i32
    %121 = arith.index_cast %120 : i32 to index
    %c0_36 = arith.constant 0 : index
    %122 = vector.load %arg8[%121, %c0_36] : memref<64x128xf32, #tpu.memory_space<vmem>>, vector<8x128xf32>
    %cst_37 = arith.constant dense<0.000000e+00> : vector<8x128xf32>
    %123 = tpu.matmul %118, %11, %cst_37 {dimension_numbers = #tpu.dot_dimension_numbers<[1], [0], [0], [1], [0, 0, 1, 1], [], []>} : vector<8x32xf32>, vector<32x128xf32>, vector<8x128xf32> -> vector<8x128xf32>
    %124 = arith.addf %122, %123 : vector<8x128xf32>
    %125 = arith.negf %124 : vector<8x128xf32>
    %126 = math.exp %125 : vector<8x128xf32>
    %cst_38 = arith.constant 1.000000e+00 : f32
    %127 = vector.broadcast %cst_38 : f32 to vector<8x128xf32>
    %128 = arith.addf %127, %126 : vector<8x128xf32>
    %129 = arith.divf %127, %128 : vector<8x128xf32>
    %130 = math.tanh %124 : vector<8x128xf32>
    %131 = vector.extract_strided_slice %129 {offsets = [0, 0], sizes = [8, 32], strides = [1, 1]} : vector<8x128xf32> to vector<8x32xf32>
    %132 = vector.extract_strided_slice %129 {offsets = [0, 32], sizes = [8, 32], strides = [1, 1]} : vector<8x128xf32> to vector<8x32xf32>
    %133 = vector.extract_strided_slice %129 {offsets = [0, 96], sizes = [8, 32], strides = [1, 1]} : vector<8x128xf32> to vector<8x32xf32>
    %134 = vector.extract_strided_slice %130 {offsets = [0, 64], sizes = [8, 32], strides = [1, 1]} : vector<8x128xf32> to vector<8x32xf32>
    %135 = arith.mulf %132, %116 : vector<8x32xf32>
    %136 = arith.mulf %131, %134 : vector<8x32xf32>
    %137 = arith.addf %135, %136 : vector<8x32xf32>
    %138 = math.tanh %137 : vector<8x32xf32>
    %139 = arith.mulf %133, %138 : vector<8x32xf32>
    %c6_i32 = arith.constant 6 : i32
    %c8_i32_39 = arith.constant 8 : i32
    %140 = arith.muli %c6_i32, %c8_i32_39 : i32
    %141 = tpu.assume_multiple %140, 8 : i32
    %142 = arith.index_cast %141 : i32 to index
    %c0_40 = arith.constant 0 : index
    %143 = vector.load %arg8[%142, %c0_40] : memref<64x128xf32, #tpu.memory_space<vmem>>, vector<8x128xf32>
    %cst_41 = arith.constant dense<0.000000e+00> : vector<8x128xf32>
    %144 = tpu.matmul %139, %11, %cst_41 {dimension_numbers = #tpu.dot_dimension_numbers<[1], [0], [0], [1], [0, 0, 1, 1], [], []>} : vector<8x32xf32>, vector<32x128xf32>, vector<8x128xf32> -> vector<8x128xf32>
    %145 = arith.addf %143, %144 : vector<8x128xf32>
    %146 = arith.negf %145 : vector<8x128xf32>
    %147 = math.exp %146 : vector<8x128xf32>
    %cst_42 = arith.constant 1.000000e+00 : f32
    %148 = vector.broadcast %cst_42 : f32 to vector<8x128xf32>
    %149 = arith.addf %148, %147 : vector<8x128xf32>
    %150 = arith.divf %148, %149 : vector<8x128xf32>
    %151 = math.tanh %145 : vector<8x128xf32>
    %152 = vector.extract_strided_slice %150 {offsets = [0, 0], sizes = [8, 32], strides = [1, 1]} : vector<8x128xf32> to vector<8x32xf32>
    %153 = vector.extract_strided_slice %150 {offsets = [0, 32], sizes = [8, 32], strides = [1, 1]} : vector<8x128xf32> to vector<8x32xf32>
    %154 = vector.extract_strided_slice %150 {offsets = [0, 96], sizes = [8, 32], strides = [1, 1]} : vector<8x128xf32> to vector<8x32xf32>
    %155 = vector.extract_strided_slice %151 {offsets = [0, 64], sizes = [8, 32], strides = [1, 1]} : vector<8x128xf32> to vector<8x32xf32>
    %156 = arith.mulf %153, %137 : vector<8x32xf32>
    %157 = arith.mulf %152, %155 : vector<8x32xf32>
    %158 = arith.addf %156, %157 : vector<8x32xf32>
    %159 = math.tanh %158 : vector<8x32xf32>
    %160 = arith.mulf %154, %159 : vector<8x32xf32>
    %c7_i32 = arith.constant 7 : i32
    %c8_i32_43 = arith.constant 8 : i32
    %161 = arith.muli %c7_i32, %c8_i32_43 : i32
    %162 = tpu.assume_multiple %161, 8 : i32
    %163 = arith.index_cast %162 : i32 to index
    %c0_44 = arith.constant 0 : index
    %164 = vector.load %arg8[%163, %c0_44] : memref<64x128xf32, #tpu.memory_space<vmem>>, vector<8x128xf32>
    %cst_45 = arith.constant dense<0.000000e+00> : vector<8x128xf32>
    %165 = tpu.matmul %160, %11, %cst_45 {dimension_numbers = #tpu.dot_dimension_numbers<[1], [0], [0], [1], [0, 0, 1, 1], [], []>} : vector<8x32xf32>, vector<32x128xf32>, vector<8x128xf32> -> vector<8x128xf32>
    %166 = arith.addf %164, %165 : vector<8x128xf32>
    %167 = arith.negf %166 : vector<8x128xf32>
    %168 = math.exp %167 : vector<8x128xf32>
    %cst_46 = arith.constant 1.000000e+00 : f32
    %169 = vector.broadcast %cst_46 : f32 to vector<8x128xf32>
    %170 = arith.addf %169, %168 : vector<8x128xf32>
    %171 = arith.divf %169, %170 : vector<8x128xf32>
    %172 = math.tanh %166 : vector<8x128xf32>
    %173 = vector.extract_strided_slice %171 {offsets = [0, 0], sizes = [8, 32], strides = [1, 1]} : vector<8x128xf32> to vector<8x32xf32>
    %174 = vector.extract_strided_slice %171 {offsets = [0, 32], sizes = [8, 32], strides = [1, 1]} : vector<8x128xf32> to vector<8x32xf32>
    %175 = vector.extract_strided_slice %171 {offsets = [0, 96], sizes = [8, 32], strides = [1, 1]} : vector<8x128xf32> to vector<8x32xf32>
    %176 = vector.extract_strided_slice %172 {offsets = [0, 64], sizes = [8, 32], strides = [1, 1]} : vector<8x128xf32> to vector<8x32xf32>
    %177 = arith.mulf %174, %158 : vector<8x32xf32>
    %178 = arith.mulf %173, %176 : vector<8x32xf32>
    %179 = arith.addf %177, %178 : vector<8x32xf32>
    %180 = math.tanh %179 : vector<8x32xf32>
    %181 = arith.mulf %175, %180 : vector<8x32xf32>
    %c8_i32_47 = arith.constant 8 : i32
    %c0_48 = arith.constant 0 : index
    %c0_49 = arith.constant 0 : index
    %182 = vector.load %arg6[%c0_48, %c0_49] : memref<8x32xf32, #tpu.memory_space<vmem>>, vector<8x32xf32>
    tpu.vector_store %arg6[%c0_48, %c0_49], %181 {strides = array<i32>} : memref<8x32xf32, #tpu.memory_space<vmem>>, vector<8x32xf32>,
    %c0_50 = arith.constant 0 : index
    %c0_51 = arith.constant 0 : index
    %183 = vector.load %arg7[%c0_50, %c0_51] : memref<8x32xf32, #tpu.memory_space<vmem>>, vector<8x32xf32>
    tpu.vector_store %arg7[%c0_50, %c0_51], %179 {strides = array<i32>} : memref<8x32xf32, #tpu.memory_space<vmem>>, vector<8x32xf32>,
    return
  }
  func.func @transform_0(%arg0: i32, %arg1: i32) -> (i32, i32, i32) {
    %c0_i32 = arith.constant 0 : i32
    %c0_i32_0 = arith.constant 0 : i32
    return %arg0, %arg1, %c0_i32 : i32, i32, i32
  }
  func.func @transform_1(%arg0: i32, %arg1: i32) -> (i32, i32) {
    %c0_i32 = arith.constant 0 : i32
    %c0_i32_0 = arith.constant 0 : i32
    %c0_i32_1 = arith.constant 0 : i32
    return %c0_i32, %c0_i32_0 : i32, i32
  }
  func.func @transform_2(%arg0: i32, %arg1: i32) -> (i32, i32) {
    %c0_i32 = arith.constant 0 : i32
    %c0_i32_0 = arith.constant 0 : i32
    %c0_i32_1 = arith.constant 0 : i32
    return %c0_i32, %c0_i32_0 : i32, i32
  }
  func.func @transform_3(%arg0: i32, %arg1: i32) -> (i32, i32) {
    %c0_i32 = arith.constant 0 : i32
    %c0_i32_0 = arith.constant 0 : i32
    %c0_i32_1 = arith.constant 0 : i32
    return %c0_i32, %c0_i32_0 : i32, i32
  }
  func.func @transform_4(%arg0: i32, %arg1: i32) -> (i32, i32) {
    %c0_i32 = arith.constant 0 : i32
    %c0_i32_0 = arith.constant 0 : i32
    return %arg0, %c0_i32 : i32, i32
  }
}

</mosaic_0001>

<bundles_post_ra>
// kernel: tpu_custom_call.1
= control target key start
LH: loop header
LB: loop body
LE: loop exit
PB: predicated region body
PF: predicated region fallthrough
CT: control target
= control target key end

     0   :  { %vm42_vm0 = vcmask 130048   ;;  %v1354_v3 = vmov 0.0|0.0   ;;  %vm22_vm1 = vcmask 261120   ;;  %vm1355_vm2 = vmmov 0   ;;  %s1572_s0 = inlined_call_operand.vmem [shape: f32[1,64,16], index: 0, kind: input, shape index: {}]   ;;  %s1573_s1 = inlined_call_operand.vmem [shape: f32[16,128], index: 1, kind: input, shape index: {}]   ;;  %s1574_s2 = inlined_call_operand.vmem [shape: f32[32,128], index: 2, kind: input, shape index: {}]   ;;  %s1575_s3 = inlined_call_operand.vmem [shape: f32[1,128], index: 3, kind: input, shape index: {}]   ;;  %s1576_s4 = inlined_call_operand.hbm [shape: f32[8,32], index: 4, kind: output, shape index: {}]  }
   0x1   :  { %v33_v0 = vld [vmem:[%s1573_s1] sm:$0xff]  ;;  %v34_v1 = vld [vmem:[%s1573_s1 + $0x8] sm:$0xff]  ;;  %1211 = vmatprep.subr.bf16.mxu1 %v1354_v3  ;;  %v182_v8 = vld [vmem:[%s1574_s2 + $0x10] sm:$0xff]  ;;  %v1356_v10 = vmov 0.0  }
   0x2   :  { %v180_v2 = vld [vmem:[%s1574_s2] sm:$0xff]  ;;  %v1207_v4 = vpack.c.bf16 %v34_v1, %v33_v0  ;;  %v181_v5 = vld [vmem:[%s1574_s2 + $0x8] sm:$0xff]  ;;  %v183_v9 = vld [vmem:[%s1574_s2 + $0x18] sm:$0xff]  ;;  %1127 = vmatprep.mubr.msk.f32.mxu1 %vm1355_vm2, %v1356_v10  ;;  %23 = vst.msk [vmem:[#allocation4] sm:$0xff] %vm22_vm1, %v1356_v10 }
   0x3   :  { %v25_v6 = vld [vmem:[%s1572_s0] sm:$0xff]  ;;  %v1402_v7 = vpack.c.bf16 %v181_v5, %v180_v2  ;;  %24 = vst.msk [vmem:[#allocation2] sm:$0xff] %vm22_vm1, %v1356_v10 }
   0x4   :  { %1107 = vmatprep.mubr.msk.f32.mxu0 %vm42_vm0, %v25_v6 }
   0x5   :  { %9 = vsyncpa [#allocation5], 0  ;;  %1208 = vmatprep.subr.bf16.mxu0 %v1207_v4  ;;  %1213 = vmatpush3.bf16.msra.mxu1 %v1402_v7  ;;  %v26_v11 = vld [vmem:[%s1572_s0 + $0x8] sm:$0xff]  ;;  %v1421_v12 = vpack.c.bf16 %v183_v9, %v182_v8  ;;  %v1442_v14 = vld [vmem:[%s1575_s3] ss:$0 sm:$0xff]  ;;  %s1357_s5 = smov 64  }
   0x6   :  { %1210 = vmatpush3.bf16.msra.mxu0 %v1207_v4  ;;  %1214 = vmatprep.subr.bf16.mxu1 %v1354_v3  ;;  %s1358_s6 = smov 32   ;;  %v27_v51 = vld [vmem:[%s1572_s0 + $0x10] sm:$0xff]  ;;  %v28_v52 = vld [vmem:[%s1572_s0 + $0x18] sm:$0xff]  ;;  %v29_v53 = vld [vmem:[%s1572_s0 + $0x20] sm:$0xff]  ;;  %s1360_s18 = smov [#allocation4]  }
   0x7   :  { %1223 = vmatprep.subr.bf16.mxu0 %v1354_v3  ;;  %v30_v54 = vld [vmem:[%s1572_s0 + $0x28] sm:$0xff]  ;;  %v31_v55 = vld [vmem:[%s1572_s0 + $0x30] sm:$0xff]  ;;  %v32_v56 = vld [vmem:[%s1572_s0 + $0x38] sm:$0xff]  ;;  %s1359_s0 = smov 96   ;;  %s1020_s19 = sshll.u32 %s1360_s18, 4  ;;  %s1021_s19 = int_to_ptr.vmem [resolvable:$true] %s1020_s19 }
   0x8   :  { %s1330_s20 = scalar_lea.vmem %s1021_s19, 128  ;;  %p1335_p1 = scmp.lt.s32.totalorder %s1021_s19, %s1021_s19 }
   0x9   :  { %1108 = vmatmul.mubr.msk.f32.vlgmr.msra.gmra.mrb[0].mxu0 %vm42_vm0, %v26_v11  ;;  %1216 = vmatpush3.bf16.msra.mxu1 %v1421_v12  ;;  %v184_v13 = vld [vmem:[#allocation4] sm:$0xff]  ;;  %p1331_p0 = scmp.ne.s32.totalorder %s1021_s19, %s1330_s20  ;;  %p1336_p2 = scmp.lt.s32.totalorder %s1330_s20, %s1330_s20 }
   0xa   :  { %1225 = vmatpush3.bf16.msra.mxu0 %v1402_v7  ;;  %1217 = vmatprep.subr.bf16.mxu1 %v1354_v3  ;;  %v185_v22 = vld [vmem:[#allocation2] sm:$0xff] }
   0xb   :  { %1226 = vmatprep.subr.bf16.mxu0 %v1354_v3  ;;  %1110 = vmatprep.mubr.msk.f32.mxu0 %vm42_vm0, %v27_v51  ;;  %p1337_p3 = por %p1336_p2, %p1335_p1 }
   0xc   :  { %1128 = vmatmul.mubr.msk.f32.vlgmr.msra.gmra.mrb[0].mxu1 %vm22_vm1, %v184_v13 }
   0xd   :  { %1219 = vmatpush3.bf16.msra.mxu1 %v1402_v7  ;;  %1138 = vmatprep.mubr.msk.f32.mxu1 %vm1355_vm2, %v1356_v10  ;;  %p1338_p4 = pnand %p1337_p3, %p1331_p0 }
   0xe   :  { %1220 = vmatprep.subr.bf16.mxu1 %v1354_v3  ;;  %1228 = vmatpush3.bf16.msra.mxu0 %v1421_v12 }
   0xf   :  { %1235 = vmatprep.subr.bf16.mxu0 %v1354_v3  ;;  %1111 = vmatmul.mubr.msk.f32.gmra.mrb[2].mxu0 %vm42_vm0, %v28_v52 }
  0x10   :  { %1113 = vmatprep.mubr.msk.f32.mxu0 %vm42_vm0, %v29_v53 }
  0x11   :  { %1222 = vmatpush3.bf16.msra.mxu1 %v1421_v12 }
  0x12   :  { %1229 = vmatprep.subr.bf16.mxu1 %v1354_v3 }
  0x13   :  { %1114 = vmatmul.mubr.msk.f32.gmra.mrb[4].mxu0 %vm42_vm0, %v30_v54 }
  0x14   :  { %1116 = vmatprep.mubr.msk.f32.mxu0 %vm42_vm0, %v31_v55 }
  0x17   :  { %1117 = vmatmul.mubr.msk.f32.gmra.mrb[6].mxu0 %vm42_vm0, %v32_v56 }
  0x18   :  { %1149 = vmatprep.mubr.msk.f32.mxu0 %vm1355_vm2, %v1356_v10 }
  0xdc   :  { %v1109_v15 = vpop.f32.mrb[0].mxu0 }
  0xdd   :  { %v133_v16 = vpop.f32.mrb[1].mxu0  ;;  %v139_v37 = vadd.f32 %v1109_v15, %v1442_v14 }
  0xde   :  { %v134_v17 = vadd.f32 %v1442_v14, %v133_v16 }
  0xdf   :  { %v257_v18 = vpop.f32.mrb[0].mxu1 }
  0xe0   :  { %v261_v19 = vadd.f32 %v257_v18, %v134_v17  ;;  %v1129_v20 = vpop.f32.mrb[1].mxu1 }
  0xe2   :  { %1266 = vtanh.f32 %v261_v19  ;;  %v1038_v23 = vmul.f32 -1.442695, %v261_v19  ;;  %v1112_v60 = vpop.f32.mrb[2].mxu0 }
  0xe3   :  { %v143_v61 = vpop.f32.mrb[3].mxu0 }
  0xe4   :  { %1268 = vpow2.f32 %v1038_v23  ;;  %v144_v4 = vadd.f32 %v1442_v14, %v143_v61 }
  0xe6   :  { %v1488_v62 = vpop.f32.mrb[4].mxu0 }
  0xe7   :  { %v1490_v63 = vpop.f32.mrb[5].mxu0 }
  0xea   :  { %v1492_v0 = vpop.f32.mrb[6].mxu0 }
  0xeb   :  { %v1494_v1 = vpop.f32.mrb[7].mxu0 }
  0xec   :  { %v1267_v21 = vpop.eup %1266 }
  0xed   :  { %275 = vrot.lane.b32.xlu0 %v1267_v21, %s1357_s5 }
  0xee   :  { %v1269_v24 = vpop.eup %1268 }
  0xef   :  { %v265_v25 = vadd.f32 1.0, %v1269_v24 }
  0xf1   :  { %270 = vrot.lane.b32.xlu0 %v185_v22, %s1358_s6  ;;  %1270 = vrcp.f32 %v265_v25 }
  0xfb   :  { %v1271_v26 = vpop.eup %1270 }
 0x15f   :  { %v276_v27 = vpop.permute.xlu0 %275 }
 0x160   :  { %v278_v28 = vmul.f32 %v1271_v26, %v276_v27 }
 0x162   :  { %280 = vrot.lane.b32.xlu1 %v278_v28, %s1358_s6 }
 0x163   :  { %v271_v29 = vpop.permute.xlu0 %270 }
 0x164   :  { %v273_v30 = vmul.f32 %v1271_v26, %v271_v29 }
 0x1d4   :  { %v281_v31 = vpop.permute.xlu1 %280 }
 0x1d5   :  { %v283_v32 = vadd.f32 %v281_v31, %v273_v30 }
 0x1d7   :  { %1272 = vtanh.f32 %v283_v32 }
 0x1e1   :  { %v1273_v33 = vpop.eup %1272 }
 0x1e2   :  { %286 = vrot.lane.b32.xlu1 %v1273_v33, %s1357_s5 }
 0x254   :  { %v287_v34 = vpop.permute.xlu1 %286 }
 0x255   :  { %v289_v35 = vmul.f32 %v1271_v26, %v287_v34  ;;  %v149_v26 = vadd.f32 %v1112_v60, %v1442_v14 }
 0x257   :  { %293 = vrot.lane.b32.xlu0 %v289_v35, %s1358_s6 }
 0x2c9   :  { %v294_v36 = vpop.permute.xlu0 %293 }
 0x2ca   :  { %1139 = vmatmul.mubr.msk.f32.vlgmr.msra.gmra.mrb[2].mxu1 %vm22_vm1, %v294_v36 }
 0x2cb   :  { %1231 = vmatpush3.bf16.msra.mxu1 %v1402_v7  ;;  %1160 = vmatprep.mubr.msk.f32.mxu1 %vm1355_vm2, %v1356_v10 }
 0x2cc   :  { %1232 = vmatprep.subr.bf16.mxu1 %v1354_v3 }
 0x2cf   :  { %1234 = vmatpush3.bf16.msra.mxu1 %v1421_v12 }
 0x2d0   :  { %1241 = vmatprep.subr.bf16.mxu1 %v1354_v3 }
 0x39d   :  { %v363_v38 = vpop.f32.mrb[2].mxu1 }
 0x39e   :  { %v367_v39 = vadd.f32 %v363_v38, %v139_v37  ;;  %v1140_v40 = vpop.f32.mrb[3].mxu1 }
 0x3a0   :  { %1274 = vtanh.f32 %v367_v39  ;;  %v1040_v42 = vmul.f32 -1.442695, %v367_v39 }
 0x3a2   :  { %1276 = vpow2.f32 %v1040_v42 }
 0x3aa   :  { %v1275_v41 = vpop.eup %1274 }
 0x3ab   :  { %377 = vrot.lane.b32.xlu1 %v1275_v41, %s1357_s5 }
 0x3ac   :  { %v1277_v43 = vpop.eup %1276 }
 0x3ad   :  { %v371_v44 = vadd.f32 1.0, %v1277_v43 }
 0x3af   :  { %1278 = vrcp.f32 %v371_v44  ;;  %v154_v44 = vadd.f32 %v1442_v14, %v1490_v63  ;;  %v159_v63 = vadd.f32 %v1488_v62, %v1442_v14 }
 0x3b9   :  { %v1279_v45 = vpop.eup %1278 }
 0x3ba   :  { %v375_v48 = vmul.f32 %v1279_v45, %v283_v32 }
 0x41d   :  { %v378_v46 = vpop.permute.xlu1 %377 }
 0x41e   :  { %v380_v47 = vmul.f32 %v1279_v45, %v378_v46 }
 0x420   :  { %382 = vrot.lane.b32.xlu0 %v380_v47, %s1358_s6 }
 0x492   :  { %v383_v49 = vpop.permute.xlu0 %382 }
 0x493   :  { %v385_v50 = vadd.f32 %v383_v49, %v375_v48 }
 0x495   :  { %1280 = vtanh.f32 %v385_v50 }
 0x49f   :  { %v1281_v57 = vpop.eup %1280 }
 0x4a0   :  { %388 = vrot.lane.b32.xlu1 %v1281_v57, %s1357_s5 }
 0x512   :  { %v389_v58 = vpop.permute.xlu1 %388 }
 0x513   :  { %v391_v59 = vmul.f32 %v1279_v45, %v389_v58 }
 0x515   :  { %395 = vrot.lane.b32.xlu0 %v391_v59, %s1358_s6 }
 0x587   :  { %v396_v2 = vpop.permute.xlu0 %395 }
 0x588   :  { %1150 = vmatmul.mubr.msk.f32.vlgmr.msra.gmra.mrb[8].mxu0 %vm22_vm1, %v396_v2 }
 0x589   :  { %1237 = vmatpush3.bf16.msra.mxu0 %v1402_v7  ;;  %1171 = vmatprep.mubr.msk.f32.mxu0 %vm1355_vm2, %v1356_v10 }
 0x58a   :  { %1238 = vmatprep.subr.bf16.mxu0 %v1354_v3 }
 0x58d   :  { %1240 = vmatpush3.bf16.msra.mxu0 %v1421_v12 }
 0x58e   :  { %1247 = vmatprep.subr.bf16.mxu0 %v1354_v3 }
 0x65b   :  { %v465_v5 = vpop.f32.mrb[8].mxu0 }
 0x65c   :  { %v469_v6 = vadd.f32 %v465_v5, %v144_v4  ;;  %v1151_v8 = vpop.f32.mrb[9].mxu0 }
 0x65e   :  { %1282 = vtanh.f32 %v469_v6  ;;  %v1042_v11 = vmul.f32 -1.442695, %v469_v6 }
 0x660   :  { %1284 = vpow2.f32 %v1042_v11 }
 0x668   :  { %v1283_v9 = vpop.eup %1282 }
 0x669   :  { %479 = vrot.lane.b32.xlu1 %v1283_v9, %s1357_s5 }
 0x66a   :  { %v1285_v13 = vpop.eup %1284 }
 0x66b   :  { %v473_v15 = vadd.f32 1.0, %v1285_v13 }
 0x66d   :  { %1286 = vrcp.f32 %v473_v15 }
 0x677   :  { %v1287_v16 = vpop.eup %1286 }
 0x678   :  { %v477_v19 = vmul.f32 %v1287_v16, %v385_v50 }
 0x6db   :  { %v480_v17 = vpop.permute.xlu1 %479 }
 0x6dc   :  { %v482_v18 = vmul.f32 %v1287_v16, %v480_v17 }
 0x6de   :  { %484 = vrot.lane.b32.xlu0 %v482_v18, %s1358_s6 }
 0x750   :  { %v485_v20 = vpop.permute.xlu0 %484 }
 0x751   :  { %v487_v21 = vadd.f32 %v485_v20, %v477_v19  ;;  %v164_v19 = vadd.f32 %v1442_v14, %v1494_v1 }
 0x753   :  { %1288 = vtanh.f32 %v487_v21 }
 0x75d   :  { %v1289_v22 = vpop.eup %1288 }
 0x75e   :  { %490 = vrot.lane.b32.xlu1 %v1289_v22, %s1357_s5 }
 0x7d0   :  { %v491_v23 = vpop.permute.xlu1 %490 }
 0x7d1   :  { %v493_v24 = vmul.f32 %v1287_v16, %v491_v23 }
 0x7d3   :  { %497 = vrot.lane.b32.xlu0 %v493_v24, %s1358_s6 }
 0x845   :  { %v498_v25 = vpop.permute.xlu0 %497 }
 0x846   :  { %1161 = vmatmul.mubr.msk.f32.vlgmr.msra.gmra.mrb[4].mxu1 %vm22_vm1, %v498_v25 }
 0x847   :  { %1243 = vmatpush3.bf16.msra.mxu1 %v1402_v7  ;;  %1182 = vmatprep.mubr.msk.f32.mxu1 %vm1355_vm2, %v1356_v10 }
 0x848   :  { %1244 = vmatprep.subr.bf16.mxu1 %v1354_v3 }
 0x84b   :  { %1246 = vmatpush3.bf16.msra.mxu1 %v1421_v12 }
 0x84c   :  { %1253 = vmatprep.subr.bf16.mxu1 %v1354_v3 }
 0x919   :  { %v567_v27 = vpop.f32.mrb[4].mxu1 }
 0x91a   :  { %v571_v28 = vadd.f32 %v567_v27, %v149_v26  ;;  %v1162_v29 = vpop.f32.mrb[5].mxu1 }
 0x91c   :  { %1290 = vtanh.f32 %v571_v28  ;;  %v1044_v31 = vmul.f32 -1.442695, %v571_v28 }
 0x91e   :  { %1292 = vpow2.f32 %v1044_v31 }
 0x926   :  { %v1291_v30 = vpop.eup %1290 }
 0x927   :  { %581 = vrot.lane.b32.xlu1 %v1291_v30, %s1357_s5 }
 0x928   :  { %v1293_v32 = vpop.eup %1292 }
 0x929   :  { %v575_v33 = vadd.f32 1.0, %v1293_v32 }
 0x92b   :  { %1294 = vrcp.f32 %v575_v33 }
 0x935   :  { %v1295_v34 = vpop.eup %1294 }
 0x936   :  { %v579_v37 = vmul.f32 %v1295_v34, %v487_v21 }
 0x999   :  { %v582_v35 = vpop.permute.xlu1 %581 }
 0x99a   :  { %v584_v36 = vmul.f32 %v1295_v34, %v582_v35 }
 0x99c   :  { %586 = vrot.lane.b32.xlu0 %v584_v36, %s1358_s6  ;;  %v169_v36 = vadd.f32 %v1492_v0, %v1442_v14 }
 0xa0e   :  { %v587_v38 = vpop.permute.xlu0 %586 }
 0xa0f   :  { %v589_v39 = vadd.f32 %v587_v38, %v579_v37 }
 0xa11   :  { %1296 = vtanh.f32 %v589_v39 }
 0xa1b   :  { %v1297_v40 = vpop.eup %1296 }
 0xa1c   :  { %592 = vrot.lane.b32.xlu1 %v1297_v40, %s1357_s5 }
 0xa8e   :  { %v593_v41 = vpop.permute.xlu1 %592 }
 0xa8f   :  { %v595_v42 = vmul.f32 %v1295_v34, %v593_v41 }
 0xa91   :  { %599 = vrot.lane.b32.xlu0 %v595_v42, %s1358_s6 }
 0xb03   :  { %v600_v43 = vpop.permute.xlu0 %599 }
 0xb04   :  { %1172 = vmatmul.mubr.msk.f32.vlgmr.msra.gmra.mrb[10].mxu0 %vm22_vm1, %v600_v43 }
 0xb05   :  { %1249 = vmatpush3.bf16.msra.mxu0 %v1402_v7  ;;  %1193 = vmatprep.mubr.msk.f32.mxu0 %vm1355_vm2, %v1356_v10 }
 0xb06   :  { %1250 = vmatprep.subr.bf16.mxu0 %v1354_v3 }
 0xb09   :  { %1252 = vmatpush3.bf16.msra.mxu0 %v1421_v12 }
 0xbd7   :  { %v669_v45 = vpop.f32.mrb[10].mxu0 }
 0xbd8   :  { %v673_v46 = vadd.f32 %v669_v45, %v154_v44  ;;  %v1173_v47 = vpop.f32.mrb[11].mxu0 }
 0xbda   :  { %1298 = vtanh.f32 %v673_v46  ;;  %v1046_v49 = vmul.f32 -1.442695, %v673_v46 }
 0xbdc   :  { %1300 = vpow2.f32 %v1046_v49 }
 0xbe4   :  { %v1299_v48 = vpop.eup %1298 }
 0xbe5   :  { %683 = vrot.lane.b32.xlu1 %v1299_v48, %s1357_s5 }
 0xbe6   :  { %v1301_v50 = vpop.eup %1300 }
 0xbe7   :  { %v677_v51 = vadd.f32 1.0, %v1301_v50 }
 0xbe9   :  { %1302 = vrcp.f32 %v677_v51 }
 0xbf3   :  { %v1303_v52 = vpop.eup %1302 }
 0xbf4   :  { %v681_v55 = vmul.f32 %v1303_v52, %v589_v39 }
 0xc57   :  { %v684_v53 = vpop.permute.xlu1 %683 }
 0xc58   :  { %v686_v54 = vmul.f32 %v1303_v52, %v684_v53 }
 0xc5a   :  { %688 = vrot.lane.b32.xlu0 %v686_v54, %s1358_s6 }
 0xccc   :  { %v689_v56 = vpop.permute.xlu0 %688 }
 0xccd   :  { %v691_v57 = vadd.f32 %v689_v56, %v681_v55 }
 0xccf   :  { %1304 = vtanh.f32 %v691_v57 }
 0xcd9   :  { %v1305_v58 = vpop.eup %1304 }
 0xcda   :  { %694 = vrot.lane.b32.xlu1 %v1305_v58, %s1357_s5 }
 0xd4c   :  { %v695_v59 = vpop.permute.xlu1 %694 }
 0xd4d   :  { %v697_v60 = vmul.f32 %v1303_v52, %v695_v59 }
 0xd4f   :  { %701 = vrot.lane.b32.xlu0 %v697_v60, %s1358_s6 }
 0xdc1   :  { %v702_v61 = vpop.permute.xlu0 %701 }
 0xdc2   :  { %1183 = vmatmul.mubr.msk.f32.vlgmr.msra.gmra.mrb[6].mxu1 %vm22_vm1, %v702_v61 }
 0xdc3   :  { %1255 = vmatpush3.bf16.msra.mxu1 %v1402_v7  ;;  %1204 = vmatprep.mubr.msk.f32.mxu1 %vm1355_vm2, %v1356_v10 }
 0xdc4   :  { %1256 = vmatprep.subr.bf16.mxu1 %v1354_v3 }
 0xdc7   :  { %1258 = vmatpush3.bf16.msra.mxu1 %v1421_v12 }
 0xe95   :  { %v771_v2 = vpop.f32.mrb[6].mxu1 }
 0xe96   :  { %v775_v4 = vadd.f32 %v771_v2, %v159_v63  ;;  %v1184_v5 = vpop.f32.mrb[7].mxu1 }
 0xe98   :  { %1306 = vtanh.f32 %v775_v4  ;;  %v1048_v8 = vmul.f32 -1.442695, %v775_v4 }
 0xe9a   :  { %1308 = vpow2.f32 %v1048_v8 }
 0xea2   :  { %v1307_v6 = vpop.eup %1306 }
 0xea3   :  { %785 = vrot.lane.b32.xlu1 %v1307_v6, %s1357_s5 }
 0xea4   :  { %v1309_v7 = vpop.eup %1308 }
 0xea5   :  { %v779_v9 = vadd.f32 1.0, %v1309_v7 }
 0xea7   :  { %1310 = vrcp.f32 %v779_v9 }
 0xeb1   :  { %v1311_v10 = vpop.eup %1310 }
 0xeb2   :  { %v783_v12 = vmul.f32 %v1311_v10, %v691_v57 }
 0xf15   :  { %v786_v11 = vpop.permute.xlu1 %785 }
 0xf16   :  { %v788_v3 = vmul.f32 %v1311_v10, %v786_v11 }
 0xf18   :  { %790 = vrot.lane.b32.xlu0 %v788_v3, %s1358_s6 }
 0xf8a   :  { %v791_v13 = vpop.permute.xlu0 %790 }
 0xf8b   :  { %v793_v62 = vadd.f32 %v791_v13, %v783_v12 }
 0xf8d   :  { %1312 = vtanh.f32 %v793_v62 }
 0xf97   :  { %v1313_v15 = vpop.eup %1312 }
 0xf98   :  { %796 = vrot.lane.b32.xlu1 %v1313_v15, %s1357_s5 }
0x100a   :  { %v797_v16 = vpop.permute.xlu1 %796 }
0x100b   :  { %v799_v17 = vmul.f32 %v1311_v10, %v797_v16 }
0x100d   :  { %803 = vrot.lane.b32.xlu0 %v799_v17, %s1358_s6 }
0x107f   :  { %v804_v18 = vpop.permute.xlu0 %803 }
0x1080   :  { %1194 = vmatmul.mubr.msk.f32.vlgmr.msra.gmra.mrb[12].mxu0 %vm22_vm1, %v804_v18 }
0x1153   :  { %v873_v20 = vpop.f32.mrb[12].mxu0 }
0x1154   :  { %v877_v21 = vadd.f32 %v873_v20, %v164_v19  ;;  %v1195_v22 = vpop.f32.mrb[13].mxu0 }
0x1156   :  { %1314 = vtanh.f32 %v877_v21  ;;  %v1050_v24 = vmul.f32 -1.442695, %v877_v21 }
0x1158   :  { %1316 = vpow2.f32 %v1050_v24 }
0x1160   :  { %v1315_v23 = vpop.eup %1314 }
0x1161   :  { %887 = vrot.lane.b32.xlu1 %v1315_v23, %s1357_s5 }
0x1162   :  { %v1317_v25 = vpop.eup %1316 }
0x1163   :  { %v881_v26 = vadd.f32 1.0, %v1317_v25 }
0x1165   :  { %1318 = vrcp.f32 %v881_v26 }
0x116f   :  { %v1319_v27 = vpop.eup %1318 }
0x1170   :  { %v885_v30 = vmul.f32 %v1319_v27, %v793_v62 }
0x11d3   :  { %v888_v28 = vpop.permute.xlu1 %887 }
0x11d4   :  { %v890_v29 = vmul.f32 %v1319_v27, %v888_v28 }
0x11d6   :  { %892 = vrot.lane.b32.xlu0 %v890_v29, %s1358_s6 }
0x1248   :  { %v893_v31 = vpop.permute.xlu0 %892 }
0x1249   :  { %v895_v1 = vadd.f32 %v893_v31, %v885_v30 }
0x124b   :  { %1320 = vtanh.f32 %v895_v1 }
0x1255   :  { %v1321_v32 = vpop.eup %1320 }
0x1256   :  { %898 = vrot.lane.b32.xlu1 %v1321_v32, %s1357_s5 }
0x12c8   :  { %v899_v33 = vpop.permute.xlu1 %898 }
0x12c9   :  { %v901_v34 = vmul.f32 %v1319_v27, %v899_v33 }
0x12cb   :  { %905 = vrot.lane.b32.xlu0 %v901_v34, %s1358_s6 }
0x133d   :  { %v906_v35 = vpop.permute.xlu0 %905 }
0x133e   :  { %1205 = vmatmul.mubr.msk.f32.vlgmr.msra.gmra.mrb[8].mxu1 %vm22_vm1, %v906_v35 }
0x1411   :  { %v975_v37 = vpop.f32.mrb[8].mxu1 }
0x1412   :  { %v979_v38 = vadd.f32 %v975_v37, %v169_v36  ;;  %v1206_v39 = vpop.f32.mrb[9].mxu1 }
0x1414   :  { %1322 = vtanh.f32 %v979_v38  ;;  %v1052_v41 = vmul.f32 -1.442695, %v979_v38 }
0x1416   :  { %1324 = vpow2.f32 %v1052_v41 }
0x141e   :  { %v1323_v40 = vpop.eup %1322 }
0x141f   :  { %989 = vrot.lane.b32.xlu1 %v1323_v40, %s1357_s5 }
0x1420   :  { %v1325_v42 = vpop.eup %1324 }
0x1421   :  { %v983_v43 = vadd.f32 1.0, %v1325_v42 }
0x1423   :  { %1326 = vrcp.f32 %v983_v43 }
0x142d   :  { %v1327_v44 = vpop.eup %1326 }
0x142e   :  { %v987_v47 = vmul.f32 %v1327_v44, %v895_v1 }
0x1491   :  { %v990_v45 = vpop.permute.xlu1 %989 }
0x1492   :  { %v992_v46 = vmul.f32 %v1327_v44, %v990_v45 }
0x1494   :  { %994 = vrot.lane.b32.xlu0 %v992_v46, %s1358_s6 }
0x1506   :  { %v995_v48 = vpop.permute.xlu0 %994 }
0x1507   :  { %v997_v14 = vadd.f32 %v995_v48, %v987_v47 }
0x1509   :  { %1328 = vtanh.f32 %v997_v14 }
0x1513   :  { %v1329_v0 = vpop.eup %1328 }
0x1514   :  { %1000 = vrot.lane.b32.xlu1 %v1329_v0, %s1357_s5 }
0x1518   :  { %1010 = vrot.lane.b32.xlu1 %v997_v14, %s1359_s0 }
0x1586   :  { %v1001_v49 = vpop.permute.xlu1 %1000 }
0x1587   :  { %v1003_v50 = vmul.f32 %v1327_v44, %v1001_v49 }
0x1589   :  { %1005 = vrot.lane.b32.xlu0 %v1003_v50, %s1358_s6 }
0x158a   :  { %v1011_v51 = vpop.permute.xlu1 %1010 }
0x158b   :  { %1013 = vst.msk [vmem:[#allocation2] sm:$0xff] %vm22_vm1, %v1011_v51 }
0x15fb   :  { %v1006_v52 = vpop.permute.xlu0 %1005 }
0x15fc   :  { %1008 = vst.msk [vmem:[#allocation4] sm:$0xff] %vm22_vm1, %v1006_v52 }
0x15fd   :  { %1341 = shalt.err (!%p1338_p4)
}
0x15fe   :  { %s1342_s23 = scalar_lea.hbm %s1576_s4, 128 }
0x15ff   :  { %p1343_p5 = scmp.ne.s32.totalorder %s1576_s4, %s1342_s23  ;;  %p1346_p6 = scmp.lt.u32.totalorder %s1342_s23, %s1576_s4 }
0x1601   :  { %p1348_p7 = pnand %p1346_p6, %p1343_p5 }
0x1603   :  { %1351 = shalt.err (!%p1348_p7)
}
0x1604   :  { %1023 = dma.vmem_to_hbm [thread:$0]  %s1021_s19, 128, %s1576_s4, [#allocation5]  }
0x1605   :  { %1352 = dma.done.wait [#allocation5], 128  }
0x1606   :  { %1353 = vsyncadd [#allocation5], 4294967168 }
0x1607   :  { %1027 = vsyncpa [#allocation5], 1 }

</bundles_post_ra>
